<compile_context>
chip_gen: v5e
topology: v5e:2x2
jax: 0.10.0
libtpu: 0.0.40
codegen_flags: <defaults>
</compile_context>

<pallas_src>
import math

import jax
import jax.numpy as jnp
from jax.experimental import pallas as pl
from jax.experimental.pallas import tpu as pltpu

_INV_SQRT2 = 1.0 / math.sqrt(2.0)


def _mlp_kernel(x_ref, w1_ref, b1_ref, w2_ref, b2_ref, o_ref, acc_ref):
    k = pl.program_id(1)

    @pl.when(k == 0)
    def _():
        acc_ref[...] = jnp.zeros_like(acc_ref)

    # Linear 1 (hidden slice): [tm, d_pad] @ [d_pad, tn] on the MXU, f32 acc.
    h = jnp.dot(x_ref[...], w1_ref[...], preferred_element_type=jnp.float32)
    h = h + b1_ref[...].astype(jnp.float32)

    # Exact (erf) GELU, matching torch.nn.GELU default.
    h = 0.5 * h * (1.0 + jax.lax.erf(h * _INV_SQRT2))

    # Linear 2 partial product: [tm, tn] @ [tn, d_pad], accumulated in f32.
    acc_ref[...] += jnp.dot(h.astype(w2_ref.dtype), w2_ref[...],
                            preferred_element_type=jnp.float32)

    @pl.when(k == pl.num_programs(1) - 1)
    def _():
        out = acc_ref[...] + b2_ref[...].astype(jnp.float32)
        o_ref[...] = out.astype(o_ref.dtype)


def _round_up(v, m):
    return (v + m - 1) // m * m


def _maybe_pad(a, pads):
    if all(lo == 0 and hi == 0 for lo, hi in pads):
        return a
    return jnp.pad(a, pads)


def _aligned_divisor(total, target):
    """Largest multiple of 128 that divides `total` and is <= max(target, 128)."""
    tn = max(128, min(total, (target // 128) * 128))
    while total % tn:
        tn -= 128
    return tn


def _vmem_ceiling_bytes():
    cap = 64 * 1024 * 1024
    try:
        cap = int(getattr(pltpu.get_tpu_info(), "vmem_capacity_bytes", cap))
    except Exception:  # CPU AOT / interpret fallbacks
        pass
    # Leave headroom for compiler-internal scratch (~81% of physical per-TC).
    return (cap * 13) // 16


def _footprint_bytes(tm, tn, d_pad, a_sz, w_sz, b_sz):
    return (2 * tm * d_pad * a_sz          # x tile (double-buffered)
            + 2 * tm * d_pad * a_sz        # out tile (double-buffered)
            + 2 * d_pad * tn * w_sz        # W1 block (double-buffered)
            + 2 * tn * d_pad * w_sz        # W2 block (double-buffered)
            + 2 * 8 * tn * b_sz            # b1 block (sublane-padded)
            + 2 * 8 * d_pad * b_sz         # b2 block
            + tm * d_pad * 4               # f32 accumulator scratch
            + tm * tn * 4)                 # f32 hidden intermediate


def general_processor(x, w1, b1, w2, b2, *, tm=None, tn=None):
    """Linear(d, 2d) -> GELU -> Linear(2d, d).

    x:  [..., d]   activations
    w1: [d, 2d]    (in, out) layout, i.e. transpose of torch's nn.Linear weight
    b1: [2d]
    w2: [2d, d]
    b2: [d]
    """
    orig_shape = x.shape
    d = int(orig_shape[-1])
    dh = int(w1.shape[1])
    assert w1.shape == (d, dh) and w2.shape == (dh, d)
    assert b1.shape == (dh,) and b2.shape == (d,)

    M = 1
    for s in orig_shape[:-1]:
        M *= int(s)
    x2 = x.reshape(M, d)

    # Lane-dense feature axes: pad to multiples of 128 only when necessary.
    # Zero-padded weight rows/cols & bias entries contribute exactly zero, so
    # the valid output region is bit-compatible with the unpadded math.
    d_pad = _round_up(d, 128)
    dh_pad = _round_up(dh, 128)
    x_p = _maybe_pad(x2, ((0, 0), (0, d_pad - d)))
    w1_p = _maybe_pad(w1, ((0, d_pad - d), (0, dh_pad - dh)))
    b1_p = _maybe_pad(b1, ((0, dh_pad - dh),)).reshape(1, dh_pad)
    w2_p = _maybe_pad(w2, ((0, dh_pad - dh), (0, d_pad - d)))
    b2_p = _maybe_pad(b2, ((0, d_pad - d),)).reshape(1, d_pad)

    a_sz = jnp.dtype(x.dtype).itemsize
    w_sz = jnp.dtype(w1.dtype).itemsize
    b_sz = jnp.dtype(b1.dtype).itemsize

    # Row tile: bigger when mem/overhead-bound (small d), 256 when MXU-bound.
    if tm is None:
        tm = 512 if d_pad <= 1024 else 256
    tm_eff = min(tm, _round_up(M, 8))

    # Hidden tile: largest 128-aligned divisor of dh_pad whose footprint fits
    # the per-TensorCore VMEM budget.
    ceiling = _vmem_ceiling_bytes()
    budget = (ceiling * 3) // 4
    if tn is None:
        tn = 1024
    tn_eff = _aligned_divisor(dh_pad, tn)
    while (tn_eff > 128 and
           _footprint_bytes(tm_eff, tn_eff, d_pad, a_sz, w_sz, b_sz) > budget):
        tn_eff = _aligned_divisor(dh_pad, tn_eff - 128)
    while (tm_eff > 8 and
           _footprint_bytes(tm_eff, tn_eff, d_pad, a_sz, w_sz, b_sz) > budget):
        tm_eff = max(8, _round_up(tm_eff // 2, 8))

    grid_m = pl.cdiv(M, tm_eff)
    grid_k = dh_pad // tn_eff
    grid = (grid_m, grid_k)

    footprint = _footprint_bytes(tm_eff, tn_eff, d_pad, a_sz, w_sz, b_sz)
    vmem_limit = int(min(max(footprint * 3 // 2, 32 * 1024 * 1024), ceiling))

    flops = 4 * M * d_pad * dh_pad + 8 * M * dh_pad
    bytes_accessed = (M * d_pad * a_sz * 2                      # x in + out
                      + grid_m * 2 * d_pad * dh_pad * w_sz      # streamed weights
                      + grid_m * (d_pad + dh_pad) * b_sz)       # biases
    cost = pl.CostEstimate(flops=int(flops),
                           transcendentals=int(M * dh_pad),
                           bytes_accessed=int(bytes_accessed))

    out = pl.pallas_call(
        _mlp_kernel,
        out_shape=jax.ShapeDtypeStruct((M, d_pad), x.dtype),
        grid_spec=pltpu.PrefetchScalarGridSpec(
            num_scalar_prefetch=0,
            grid=grid,
            in_specs=[
                pl.BlockSpec((tm_eff, d_pad), lambda i, k: (i, 0)),   # x rows
                pl.BlockSpec((d_pad, tn_eff), lambda i, k: (0, k)),   # W1 slice
                pl.BlockSpec((1, tn_eff), lambda i, k: (0, k)),       # b1 slice
                pl.BlockSpec((tn_eff, d_pad), lambda i, k: (k, 0)),   # W2 slice
                pl.BlockSpec((1, d_pad), lambda i, k: (0, 0)),        # b2
            ],
            out_specs=pl.BlockSpec((tm_eff, d_pad), lambda i, k: (i, 0)),
            scratch_shapes=[pltpu.VMEM((tm_eff, d_pad), jnp.float32)],
        ),
        compiler_params=pltpu.CompilerParams(
            dimension_semantics=("parallel", "arbitrary"),
            vmem_limit_bytes=vmem_limit),
        cost_estimate=cost,
    )(x_p, w1_p, b1_p, w2_p, b2_p)

    return out[:, :d].reshape(orig_shape)


def _ref(x, w1, b1, w2, b2):
    h = x.astype(jnp.float32) @ w1.astype(jnp.float32) + b1
    h = 0.5 * h * (1.0 + jax.lax.erf(h / jnp.sqrt(2.0)))
    return h @ w2.astype(jnp.float32) + b2


if __name__ == "__main__":
    d_model = 32
    batch, seq = 2, 8

    key = jax.random.PRNGKey(0)
    kx, kw1, kb1, kw2, kb2 = jax.random.split(key, 5)

    # Deterministic parameter init (uniform, roughly matching nn.Linear scale),
    # stored in [in_features, out_features] layout.
    lim1 = 1.0 / math.sqrt(d_model)
    lim2 = 1.0 / math.sqrt(2 * d_model)
    w1 = jax.random.uniform(kw1, (d_model, 2 * d_model), jnp.float32, -lim1, lim1)
    b1 = jax.random.uniform(kb1, (2 * d_model,), jnp.float32, -lim1, lim1)
    w2 = jax.random.uniform(kw2, (2 * d_model, d_model), jnp.float32, -lim2, lim2)
    b2 = jax.random.uniform(kb2, (d_model,), jnp.float32, -lim2, lim2)

    x = jax.random.normal(kx, (batch, seq, d_model), jnp.float32)

    out = general_processor(x, w1, b1, w2, b2)
    jax.block_until_ready(out)

    ref = _ref(x.reshape(-1, d_model), w1, b1, w2, b2).reshape(x.shape)
    assert out.shape == x.shape, "shape mismatch"
    assert jnp.allclose(out, ref, atol=1e-5, rtol=1e-5), "mismatch vs reference"

    print("KERNEL_OK")
</pallas_src>

<mosaic_0001>
module attributes {stable_mosaic.version = 11 : i64} {
  func.func @_mlp_kernel(%arg0: i32, %arg1: i32, %arg2: memref<16x128xf32, #tpu.memory_space<vmem>>, %arg3: memref<128x128xf32, #tpu.memory_space<vmem>>, %arg4: memref<1x128xf32, #tpu.memory_space<vmem>>, %arg5: memref<128x128xf32, #tpu.memory_space<vmem>>, %arg6: memref<1x128xf32, #tpu.memory_space<vmem>>, %arg7: memref<16x128xf32, #tpu.memory_space<vmem>>, %arg8: memref<16x128xf32, #tpu.memory_space<vmem>>) attributes {dimension_semantics = [#tpu.dimension_semantics<parallel>, #tpu.dimension_semantics<arbitrary>], iteration_bounds = array<i64: 1, 1>, scalar_prefetch = 0 : i64, scratch_operands = 1 : i64, tpu.core_type = #tpu.core_type<tc>, window_params = [{transform_indices = @transform_0, window_bounds = array<i64: 16, 128>}, {transform_indices = @transform_1, window_bounds = array<i64: 128, 128>}, {transform_indices = @transform_2, window_bounds = array<i64: 1, 128>}, {transform_indices = @transform_3, window_bounds = array<i64: 128, 128>}, {pipeline_mode = #tpu.pipeline_mode<synchronous>, transform_indices = @transform_4, window_bounds = array<i64: 1, 128>}, {transform_indices = @transform_5, window_bounds = array<i64: 16, 128>}]} {
    %c0_i32 = arith.constant 0 : i32
    %0 = arith.cmpi eq, %arg1, %c0_i32 : i32
    %1 = arith.extui %0 : i1 to i32
    %c0_i32_0 = arith.constant 0 : i32
    %2 = arith.cmpi ne, %1, %c0_i32_0 : i32
    scf.if %2 {
      %cst_18 = arith.constant 0.000000e+00 : f32
      %25 = vector.broadcast %cst_18 : f32 to vector<16x128xf32>
      %c0_19 = arith.constant 0 : index
      %c0_20 = arith.constant 0 : index
      %26 = vector.load %arg8[%c0_19, %c0_20] : memref<16x128xf32, #tpu.memory_space<vmem>>, vector<16x128xf32>
      tpu.vector_store %arg8[%c0_19, %c0_20], %25 {strides = array<i32>} : memref<16x128xf32, #tpu.memory_space<vmem>>, vector<16x128xf32>,
    } else {
    }
    %c0 = arith.constant 0 : index
    %c0_1 = arith.constant 0 : index
    %3 = vector.load %arg2[%c0, %c0_1] : memref<16x128xf32, #tpu.memory_space<vmem>>, vector<16x128xf32>
    %c0_2 = arith.constant 0 : index
    %c0_3 = arith.constant 0 : index
    %4 = vector.load %arg3[%c0_2, %c0_3] : memref<128x128xf32, #tpu.memory_space<vmem>>, vector<128x128xf32>
    %cst = arith.constant dense<0.000000e+00> : vector<16x128xf32>
    %5 = tpu.matmul %3, %4, %cst {dimension_numbers = #tpu.dot_dimension_numbers<[1], [0], [0], [1], [0, 0, 1, 1], [], []>} : vector<16x128xf32>, vector<128x128xf32>, vector<16x128xf32> -> vector<16x128xf32>
    %c0_4 = arith.constant 0 : index
    %c0_5 = arith.constant 0 : index
    %6 = vector.load %arg4[%c0_4, %c0_5] : memref<1x128xf32, #tpu.memory_space<vmem>>, vector<1x128xf32>
    %7 = vector.broadcast %6 : vector<1x128xf32> to vector<16x128xf32>
    %8 = arith.addf %5, %7 : vector<16x128xf32>
    %cst_6 = arith.constant 5.000000e-01 : f32
    %9 = vector.broadcast %cst_6 : f32 to vector<16x128xf32>
    %10 = arith.mulf %9, %8 : vector<16x128xf32>
    %cst_7 = arith.constant 0.707106769 : f32
    %11 = vector.broadcast %cst_7 : f32 to vector<16x128xf32>
    %12 = arith.mulf %8, %11 : vector<16x128xf32>
    %13 = math.erf %12 : vector<16x128xf32>
    %cst_8 = arith.constant 1.000000e+00 : f32
    %14 = vector.broadcast %cst_8 : f32 to vector<16x128xf32>
    %15 = arith.addf %14, %13 : vector<16x128xf32>
    %16 = arith.mulf %10, %15 : vector<16x128xf32>
    %c0_9 = arith.constant 0 : index
    %c0_10 = arith.constant 0 : index
    %17 = vector.load %arg8[%c0_9, %c0_10] : memref<16x128xf32, #tpu.memory_space<vmem>>, vector<16x128xf32>
    %c0_11 = arith.constant 0 : index
    %c0_12 = arith.constant 0 : index
    %18 = vector.load %arg5[%c0_11, %c0_12] : memref<128x128xf32, #tpu.memory_space<vmem>>, vector<128x128xf32>
    %cst_13 = arith.constant dense<0.000000e+00> : vector<16x128xf32>
    %19 = tpu.matmul %16, %18, %cst_13 {dimension_numbers = #tpu.dot_dimension_numbers<[1], [0], [0], [1], [0, 0, 1, 1], [], []>} : vector<16x128xf32>, vector<128x128xf32>, vector<16x128xf32> -> vector<16x128xf32>
    %20 = arith.addf %17, %19 : vector<16x128xf32>
    %c0_14 = arith.constant 0 : index
    %c0_15 = arith.constant 0 : index
    %21 = vector.load %arg8[%c0_14, %c0_15] : memref<16x128xf32, #tpu.memory_space<vmem>>, vector<16x128xf32>
    tpu.vector_store %arg8[%c0_14, %c0_15], %20 {strides = array<i32>} : memref<16x128xf32, #tpu.memory_space<vmem>>, vector<16x128xf32>,
    %c0_i32_16 = arith.constant 0 : i32
    %22 = arith.cmpi eq, %arg1, %c0_i32_16 : i32
    %23 = arith.extui %22 : i1 to i32
    %c0_i32_17 = arith.constant 0 : i32
    %24 = arith.cmpi ne, %23, %c0_i32_17 : i32
    scf.if %24 {
      %c0_18 = arith.constant 0 : index
      %c0_19 = arith.constant 0 : index
      %25 = vector.load %arg8[%c0_18, %c0_19] : memref<16x128xf32, #tpu.memory_space<vmem>>, vector<16x128xf32>
      %c0_20 = arith.constant 0 : index
      %c0_21 = arith.constant 0 : index
      %26 = vector.load %arg6[%c0_20, %c0_21] : memref<1x128xf32, #tpu.memory_space<vmem>>, vector<1x128xf32>
      %27 = vector.broadcast %26 : vector<1x128xf32> to vector<16x128xf32>
      %28 = arith.addf %25, %27 : vector<16x128xf32>
      %c0_22 = arith.constant 0 : index
      %c0_23 = arith.constant 0 : index
      %29 = vector.load %arg7[%c0_22, %c0_23] : memref<16x128xf32, #tpu.memory_space<vmem>>, vector<16x128xf32>
      tpu.vector_store %arg7[%c0_22, %c0_23], %28 {strides = array<i32>} : memref<16x128xf32, #tpu.memory_space<vmem>>, vector<16x128xf32>,
    } else {
    }
    return
  }
  func.func @transform_0(%arg0: i32, %arg1: i32) -> (i32, i32) {
    %c0_i32 = arith.constant 0 : i32
    %c0_i32_0 = arith.constant 0 : i32
    return %arg0, %c0_i32 : i32, i32
  }
  func.func @transform_1(%arg0: i32, %arg1: i32) -> (i32, i32) {
    %c0_i32 = arith.constant 0 : i32
    %c0_i32_0 = arith.constant 0 : i32
    return %c0_i32, %arg1 : i32, i32
  }
  func.func @transform_2(%arg0: i32, %arg1: i32) -> (i32, i32) {
    %c0_i32 = arith.constant 0 : i32
    %c0_i32_0 = arith.constant 0 : i32
    return %c0_i32, %arg1 : i32, i32
  }
  func.func @transform_3(%arg0: i32, %arg1: i32) -> (i32, i32) {
    %c0_i32 = arith.constant 0 : i32
    %c0_i32_0 = arith.constant 0 : i32
    return %arg1, %c0_i32 : i32, i32
  }
  func.func @transform_4(%arg0: i32, %arg1: i32) -> (i32, i32) {
    %c0_i32 = arith.constant 0 : i32
    %c0_i32_0 = arith.constant 0 : i32
    %c0_i32_1 = arith.constant 0 : i32
    return %c0_i32, %c0_i32_0 : i32, i32
  }
  func.func @transform_5(%arg0: i32, %arg1: i32) -> (i32, i32) {
    %c0_i32 = arith.constant 0 : i32
    %c0_i32_0 = arith.constant 0 : i32
    return %arg0, %c0_i32 : i32, i32
  }
}

</mosaic_0001>

<bundles_post_ra>
// kernel: tpu_custom_call.1
= control target key start
LH: loop header
LB: loop body
LE: loop exit
PB: predicated region body
PF: predicated region fallthrough
CT: control target
= control target key end

     0   :  { %10 = vsyncpa [#allocation4], 0  ;;  %s529_s0 = inlined_call_operand.hbm [shape: f32[16,128], index: 0, kind: input, shape index: {}]   ;;  %s530_s1 = inlined_call_operand.hbm [shape: f32[128,128], index: 1, kind: input, shape index: {}]   ;;  %s531_s2 = inlined_call_operand.vmem [shape: f32[1,128], index: 2, kind: input, shape index: {}]   ;;  %s532_s3 = inlined_call_operand.hbm [shape: f32[128,128], index: 3, kind: input, shape index: {}]   ;;  %s533_s4 = inlined_call_operand.vmem [shape: f32[1,128], index: 4, kind: input, shape index: {}]   ;;  %s534_s5 = inlined_call_operand.hbm [shape: f32[16,128], index: 5, kind: output, shape index: {}]  }
   0x1   :  { %11 = vsyncpa [#allocation7], 0 }
   0x2   :  { %12 = vsyncpa [#allocation5], 0  ;;  %s30_s20 = sshll.u32 %s530_s1, 4  ;;  %s433_s21 = smov [#allocation6]   ;;  %s31_s20 = int_to_ptr.hbm [resolvable:$true] %s30_s20 }
   0x3   :  { %s32_s22 = sshll.u32 %s433_s21, 4  ;;  %s17_s25 = sshll.u32 %s529_s0, 4  ;;  %s33_s22 = int_to_ptr.vmem [resolvable:$true] %s32_s22  ;;  %s18_s25 = int_to_ptr.hbm [resolvable:$true] %s17_s25 }
   0x4   :  { %s434_s26 = smov 128   ;;  %s435_s27 = smov 8  }
   0x5   :  { %38 = dma.hbm_to_vmem [thread:$0]  %s31_s20, 2048, %s33_s22, [#allocation7], %s434_s26, %s434_s26, %s435_s27  }
   0x6   :  { %s436_s28 = smov [#allocation3]   ;;  %s45_s1 = sshll.u32 %s532_s3, 4  ;;  %s46_s1 = int_to_ptr.hbm [resolvable:$true] %s45_s1 }
   0x7   :  { %s19_s29 = sshll.u32 %s436_s28, 4  ;;  %s437_s0 = smov [#allocation8]   ;;  %s20_s29 = int_to_ptr.vmem [resolvable:$true] %s19_s29 }
   0x8   :  { %25 = dma.hbm_to_vmem [thread:$0]  %s18_s25, 256, %s20_s29, [#allocation4], %s434_s26, %s434_s26, %s435_s27  }
   0x9   :  { %s47_s7 = sshll.u32 %s437_s0, 4  ;;  %s48_s7 = int_to_ptr.vmem [resolvable:$true] %s47_s7 }
   0xa   :  { %53 = dma.hbm_to_vmem [thread:$0]  %s46_s1, 2048, %s48_s7, [#allocation7], %s434_s26, %s434_s26, %s435_s27  }
   0xb   :  { %427 = dma.done.wait [#allocation4], 256  }
   0xc   :  { %428 = vsyncadd [#allocation4], 4294967040 }
   0xd   :  { %429 = dma.done.wait [#allocation7], 4096  }
   0xe   :  { %430 = vsyncadd [#allocation7], 4294963200  ;;  %v91_v0 = vld [vmem:[#allocation6 + $0x78] sm:$0xff]  ;;  %v90_v1 = vld [vmem:[#allocation6 + $0x70] sm:$0xff]  ;;  %s438_s10 = smov [#allocation9]   ;;  %s271_s14 = sshll.u32 %s534_s5, 4  ;;  %s272_s14 = int_to_ptr.hbm [resolvable:$true] %s271_s14 }
   0xf   :  { %96 = vmatpush.msra.mxu0 %v91_v0  ;;  %287 = vmatpush.msra.mxu2 %v91_v0  ;;  %v89_v2 = vld [vmem:[#allocation6 + $0x68] sm:$0xff]  ;;  %v88_v3 = vld [vmem:[#allocation6 + $0x60] sm:$0xff]  ;;  %v87_v4 = vld [vmem:[#allocation6 + $0x58] sm:$0xff]  ;;  %s269_s11 = sshll.u32 %s438_s10, 4  ;;  %s270_s11 = int_to_ptr.vmem [resolvable:$true] %s269_s11 }
  0x10   :  { %v86_v5 = vld [vmem:[#allocation6 + $0x50] sm:$0xff]  ;;  %v85_v6 = vld [vmem:[#allocation6 + $0x48] sm:$0xff]  ;;  %v84_v7 = vld [vmem:[#allocation6 + $0x40] sm:$0xff] }
  0x11   :  { %97 = vmatpush.msra.mxu0 %v90_v1  ;;  %288 = vmatpush.msra.mxu2 %v90_v1  ;;  %v83_v8 = vld [vmem:[#allocation6 + $0x38] sm:$0xff]  ;;  %v82_v9 = vld [vmem:[#allocation6 + $0x30] sm:$0xff]  ;;  %v81_v10 = vld [vmem:[#allocation6 + $0x28] sm:$0xff] }
  0x12   :  { %v80_v11 = vld [vmem:[#allocation6 + $0x20] sm:$0xff]  ;;  %v79_v12 = vld [vmem:[#allocation6 + $0x18] sm:$0xff]  ;;  %v78_v13 = vld [vmem:[#allocation6 + $0x10] sm:$0xff] }
  0x13   :  { %98 = vmatpush.msra.mxu0 %v89_v2  ;;  %289 = vmatpush.msra.mxu2 %v89_v2  ;;  %v77_v14 = vld [vmem:[#allocation6 + $0x8] sm:$0xff]  ;;  %v76_v15 = vld [vmem:[#allocation6] sm:$0xff]  ;;  %v74_v16 = vld [vmem:[#allocation3] sm:$0xff] }
  0x14   :  { %v75_v17 = vld [vmem:[#allocation3 + $0x8] sm:$0xff]  ;;  %v223_v19 = vld [vmem:[#allocation8 + $0x70] sm:$0xff]  ;;  %v222_v20 = vld [vmem:[#allocation8 + $0x68] sm:$0xff] }
  0x15   :  { %99 = vmatpush.msra.mxu0 %v88_v3  ;;  %290 = vmatpush.msra.mxu2 %v88_v3  ;;  %v224_v18 = vld [vmem:[#allocation8 + $0x78] sm:$0xff]  ;;  %v221_v21 = vld [vmem:[#allocation8 + $0x60] sm:$0xff]  ;;  %v325_v22 = vld [vmem:[%s531_s2] ss:$0 sm:$0xff] }
  0x16   :  { %225 = vmatpush.msra.mxu1 %v224_v18  ;;  %303 = vmatpush.msra.mxu3 %v224_v18  ;;  %v220_v23 = vld [vmem:[#allocation8 + $0x58] sm:$0xff]  ;;  %v219_v25 = vld [vmem:[#allocation8 + $0x50] sm:$0xff]  ;;  %v218_v27 = vld [vmem:[#allocation8 + $0x48] sm:$0xff] }
  0x17   :  { %100 = vmatpush.msra.mxu0 %v87_v4  ;;  %291 = vmatpush.msra.mxu2 %v87_v4  ;;  %v217_v29 = vld [vmem:[#allocation8 + $0x40] sm:$0xff]  ;;  %v216_v30 = vld [vmem:[#allocation8 + $0x38] sm:$0xff]  ;;  %v215_v33 = vld [vmem:[#allocation8 + $0x30] sm:$0xff] }
  0x18   :  { %226 = vmatpush.msra.mxu1 %v223_v19  ;;  %304 = vmatpush.msra.mxu3 %v223_v19  ;;  %v214_v36 = vld [vmem:[#allocation8 + $0x28] sm:$0xff]  ;;  %v213_v39 = vld [vmem:[#allocation8 + $0x20] sm:$0xff]  ;;  %v212_v43 = vld [vmem:[#allocation8 + $0x18] sm:$0xff] }
  0x19   :  { %101 = vmatpush.msra.mxu0 %v86_v5  ;;  %292 = vmatpush.msra.mxu2 %v86_v5  ;;  %v211_v47 = vld [vmem:[#allocation8 + $0x10] sm:$0xff]  ;;  %v210_v52 = vld [vmem:[#allocation8 + $0x8] sm:$0xff]  ;;  %v209_v56 = vld [vmem:[#allocation8] sm:$0xff] }
  0x1a   :  { %227 = vmatpush.msra.mxu1 %v222_v20  ;;  %305 = vmatpush.msra.mxu3 %v222_v20 }
  0x1b   :  { %102 = vmatpush.msra.mxu0 %v85_v6  ;;  %293 = vmatpush.msra.mxu2 %v85_v6 }
  0x1c   :  { %228 = vmatpush.msra.mxu1 %v221_v21  ;;  %306 = vmatpush.msra.mxu3 %v221_v21 }
  0x1d   :  { %103 = vmatpush.msra.mxu0 %v84_v7  ;;  %294 = vmatpush.msra.mxu2 %v84_v7 }
  0x1e   :  { %229 = vmatpush.msra.mxu1 %v220_v23  ;;  %307 = vmatpush.msra.mxu3 %v220_v23 }
  0x1f   :  { %104 = vmatpush.msra.mxu0 %v83_v8  ;;  %295 = vmatpush.msra.mxu2 %v83_v8 }
  0x20   :  { %230 = vmatpush.msra.mxu1 %v219_v25  ;;  %308 = vmatpush.msra.mxu3 %v219_v25 }
  0x21   :  { %105 = vmatpush.msra.mxu0 %v82_v9  ;;  %296 = vmatpush.msra.mxu2 %v82_v9 }
  0x22   :  { %231 = vmatpush.msra.mxu1 %v218_v27  ;;  %309 = vmatpush.msra.mxu3 %v218_v27 }
  0x23   :  { %106 = vmatpush.msra.mxu0 %v81_v10  ;;  %297 = vmatpush.msra.mxu2 %v81_v10 }
  0x24   :  { %232 = vmatpush.msra.mxu1 %v217_v29  ;;  %310 = vmatpush.msra.mxu3 %v217_v29 }
  0x25   :  { %107 = vmatpush.msra.mxu0 %v80_v11  ;;  %298 = vmatpush.msra.mxu2 %v80_v11 }
  0x26   :  { %233 = vmatpush.msra.mxu1 %v216_v30  ;;  %311 = vmatpush.msra.mxu3 %v216_v30 }
  0x27   :  { %108 = vmatpush.msra.mxu0 %v79_v12  ;;  %299 = vmatpush.msra.mxu2 %v79_v12 }
  0x28   :  { %234 = vmatpush.msra.mxu1 %v215_v33  ;;  %312 = vmatpush.msra.mxu3 %v215_v33 }
  0x29   :  { %109 = vmatpush.msra.mxu0 %v78_v13  ;;  %300 = vmatpush.msra.mxu2 %v78_v13 }
  0x2a   :  { %235 = vmatpush.msra.mxu1 %v214_v36  ;;  %313 = vmatpush.msra.mxu3 %v214_v36 }
  0x2b   :  { %110 = vmatpush.msra.mxu0 %v77_v14  ;;  %301 = vmatpush.msra.mxu2 %v77_v14 }
  0x2c   :  { %236 = vmatpush.msra.mxu1 %v213_v39  ;;  %314 = vmatpush.msra.mxu3 %v213_v39 }
  0x2d   :  { %111 = vmatpush.msra.mxu0 %v76_v15  ;;  %302 = vmatpush.msra.mxu2 %v76_v15 }
  0x2e   :  { %112 = vmatmul.f32.vlgmr.msra.gmra.mxu0 %v74_v16  ;;  %115 = vmatmul.f32.vlgmr.msra.gmra.mxu2 %v75_v17 }
  0x2f   :  { %237 = vmatpush.msra.mxu1 %v212_v43  ;;  %315 = vmatpush.msra.mxu3 %v212_v43 }
  0x31   :  { %238 = vmatpush.msra.mxu1 %v211_v47  ;;  %316 = vmatpush.msra.mxu3 %v211_v47 }
  0x33   :  { %239 = vmatpush.msra.mxu1 %v210_v52  ;;  %317 = vmatpush.msra.mxu3 %v210_v52 }
  0x35   :  { %240 = vmatpush.msra.mxu1 %v209_v56  ;;  %318 = vmatpush.msra.mxu3 %v209_v56  ;;  %v326_v56 = vld [vmem:[%s533_s4] ss:$0 sm:$0xff] }
  0xab   :  { %v113_v24 = vpop.f32.mrf.mxu0 }
  0xac   :  { %v490_v26 = vadd.f32 %v325_v22, %v113_v24 }
  0xae   :  { %v493_v28 = vmul.f32 0.70710677, %v490_v26  ;;  %v119_v47 = vmul.f32 0.5, %v490_v26 }
  0xb0   :  { %v123_v31 = vmul.f32 %v493_v28, %v493_v28 }
  0xb1   :  { %v116_v32 = vpop.f32.mrf.mxu2 }
  0xb2   :  { %v497_v34 = vmin.f32 %v123_v31, 16.0  ;;  %v499_v35 = vadd.f32 %v325_v22, %v116_v32 }
  0xb4   :  { %v125_v37 = vmul.f32 2.1237322e-06, %v497_v34  ;;  %v503_v38 = vmul.f32 0.70710677, %v499_v35  ;;  %v136_v40 = vmul.f32 3.8918573e-05, %v497_v34 }
  0xb6   :  { %v126_v41 = vadd.f32 0.00028619796, %v125_v37  ;;  %v163_v42 = vmul.f32 %v503_v38, %v503_v38  ;;  %v137_v44 = vadd.f32 0.001143296, %v136_v40 }
  0xb8   :  { %v127_v45 = vmul.f32 %v126_v41, %v497_v34  ;;  %v164_v46 = vmin.f32 %v163_v42, 16.0  ;;  %v138_v48 = vmul.f32 %v137_v44, %v497_v34 }
  0xba   :  { %v165_v49 = vmul.f32 2.1237322e-06, %v164_v46  ;;  %v176_v50 = vmul.f32 3.8918573e-05, %v164_v46  ;;  %v128_v51 = vadd.f32 0.0036580483, %v127_v45 }
  0xbb   :  { %v139_v53 = vadd.f32 0.014752088, %v138_v48 }
  0xbc   :  { %v166_v54 = vadd.f32 0.00028619796, %v165_v49  ;;  %v177_v55 = vadd.f32 0.001143296, %v176_v50  ;;  %v129_v60 = vmul.f32 %v128_v51, %v497_v34 }
  0xbd   :  { %v140_v57 = vmul.f32 %v139_v53, %v497_v34  ;;  %v120_v53 = vmul.f32 0.5, %v499_v35 }
  0xbe   :  { %v167_v58 = vmul.f32 %v166_v54, %v164_v46  ;;  %v178_v59 = vmul.f32 %v177_v55, %v164_v46  ;;  %v130_v2 = vadd.f32 0.05243302, %v129_v60 }
  0xbf   :  { %v141_v61 = vadd.f32 0.112945676, %v140_v57 }
  0xc0   :  { %v168_v62 = vadd.f32 0.0036580483, %v167_v58  ;;  %v179_v63 = vadd.f32 0.014752088, %v178_v59  ;;  %v131_v8 = vmul.f32 %v130_v2, %v497_v34 }
  0xc1   :  { %v142_v0 = vmul.f32 %v141_v61, %v497_v34 }
  0xc2   :  { %v180_v1 = vmul.f32 %v179_v63, %v164_v46  ;;  %v169_v4 = vmul.f32 %v168_v62, %v164_v46  ;;  %v132_v13 = vadd.f32 0.18741608, %v131_v8 }
  0xc3   :  { %v143_v3 = vadd.f32 0.4994258, %v142_v0 }
  0xc4   :  { %v181_v5 = vadd.f32 0.112945676, %v180_v1  ;;  %v170_v10 = vadd.f32 0.05243302, %v169_v4  ;;  %v133_v17 = vmul.f32 %v132_v13, %v497_v34 }
  0xc5   :  { %v144_v6 = vmul.f32 %v143_v3, %v497_v34 }
  0xc6   :  { %v182_v7 = vmul.f32 %v181_v5, %v164_v46  ;;  %v171_v14 = vmul.f32 %v170_v10, %v164_v46  ;;  %v134_v21 = vadd.f32 1.1283791, %v133_v17 }
  0xc7   :  { %v145_v9 = vadd.f32 1.0, %v144_v6 }
  0xc8   :  { %v183_v11 = vadd.f32 0.4994258, %v182_v7  ;;  %v172_v18 = vadd.f32 0.18741608, %v171_v14  ;;  %v135_v31 = vmul.f32 %v134_v21, %v493_v28 }
  0xc9   :  { %327 = vrcp.f32 %v145_v9  ;;  %v157_v22 = vand.u32 2147483648, %v145_v9  ;;  %v155_v27 = vand.u32 2147483647, %v145_v9  ;;  %vm151_vm1 = vweird.f32 %v145_v9 }
  0xca   :  { %v184_v12 = vmul.f32 %v183_v11, %v164_v46  ;;  %v173_v24 = vmul.f32 %v172_v18, %v164_v46 }
  0xcb   :  { %v158_v32 = vor.u32 1.1754944e-38, %v157_v22  ;;  %vm156_vm3 = vcmp.eq.f32.partialorder %v155_v27, 8.507059e+37 }
  0xcc   :  { %v185_v15 = vadd.f32 1.0, %v184_v12  ;;  %v174_v36 = vadd.f32 1.1283791, %v173_v24 }
  0xce   :  { %329 = vrcp.f32 %v185_v15  ;;  %v197_v37 = vand.u32 2147483648, %v185_v15  ;;  %v195_v41 = vand.u32 2147483647, %v185_v15  ;;  %vm191_vm5 = vweird.f32 %v185_v15 }
  0xcf   :  { %v328_v16 = vpop.eup %327  ;;  %v175_v46 = vmul.f32 %v174_v36, %v503_v38 }
  0xd0   :  { %v147_v19 = vmul.f32 %v328_v16, %v145_v9  ;;  %vm152_vm0 = vweird.f32 %v328_v16  ;;  %v198_v45 = vor.u32 1.1754944e-38, %v197_v37  ;;  %vm196_vm7 = vcmp.eq.f32.partialorder %v195_v41, 8.507059e+37 }
  0xd1   :  { %vm153_vm2 = vmor %vm151_vm1, %vm152_vm0 }
  0xd2   :  { %v148_v20 = vsub.f32 1.0, %v147_v19 }
  0xd4   :  { %v330_v23 = vpop.eup %329  ;;  %v149_v25 = vmul.f32 %v328_v16, %v148_v20 }
  0xd5   :  { %v187_v29 = vmul.f32 %v330_v23, %v185_v15  ;;  %vm192_vm4 = vweird.f32 %v330_v23 }
  0xd6   :  { %v150_v30 = vadd.f32 %v328_v16, %v149_v25  ;;  %vm193_vm6 = vmor %vm191_vm5, %vm192_vm4 }
  0xd7   :  { %v188_v33 = vsub.f32 1.0, %v187_v29 }
  0xd8   :  { %v154_v34 = vsel %vm153_vm2, %v328_v16, %v150_v30 }
  0xd9   :  { %v159_v39 = vsel %vm156_vm3, %v158_v32, %v154_v34  ;;  %v189_v40 = vmul.f32 %v330_v23, %v188_v33 }
  0xda   :  { %v160_v42 = vmul.f32 %v159_v39, %v135_v31 }
  0xdb   :  { %v190_v43 = vadd.f32 %v330_v23, %v189_v40 }
  0xdc   :  { %v285_v44 = vclamps-f32 %v160_v42, 1.0 }
  0xdd   :  { %v194_v28 = vsel %vm193_vm6, %v330_v23, %v190_v43 }
  0xde   :  { %v203_v48 = vadd.f32 1.0, %v285_v44  ;;  %v199_v49 = vsel %vm196_vm7, %v198_v45, %v194_v28 }
  0xdf   :  { %v200_v50 = vmul.f32 %v199_v49, %v175_v46 }
  0xe0   :  { %v205_v51 = vmul.f32 %v203_v48, %v119_v47 }
  0xe1   :  { %v286_v52 = vclamps-f32 %v200_v50, 1.0 }
  0xe2   :  { %241 = vmatmul.f32.vlgmr.msra.gmra.mxu1 %v205_v51 }
  0xe3   :  { %v204_v54 = vadd.f32 1.0, %v286_v52 }
  0xe5   :  { %v206_v55 = vmul.f32 %v204_v54, %v120_v53 }
  0xe7   :  { %244 = vmatmul.f32.vlgmr.msra.gmra.mxu3 %v206_v55 }
 0x15f   :  { %v242_v38 = vpop.f32.mrf.mxu1 }
 0x160   :  { %v261_v57 = vadd.f32 %v326_v56, %v242_v38 }
 0x162   :  { %263 = vst [vmem:[#allocation9] sm:$0xff] %v261_v57 }
 0x16a   :  { %v245_v26 = vpop.f32.mrf.mxu3 }
 0x16b   :  { %v262_v58 = vadd.f32 %v326_v56, %v245_v26 }
 0x16d   :  { %264 = vst [vmem:[#allocation9 + $0x8] sm:$0xff] %v262_v58 }
 0x16e   :  { %277 = dma.vmem_to_hbm [thread:$0]  %s270_s11, 256, %s272_s14, [#allocation5], %s434_s26, %s434_s26, %s435_s27  }
 0x16f   :  { %431 = dma.done.wait [#allocation5], 256  }
 0x170   :  { %432 = vsyncadd [#allocation5], 4294967040 }
 0x171   :  { %282 = vsyncpa [#allocation4], 1 }
 0x172   :  { %283 = vsyncpa [#allocation7], 1 }
 0x173   :  { %284 = vsyncpa [#allocation5], 1 }

</bundles_post_ra>
